<compile_context>
chip_gen: v5e
topology: v5e:2x2
jax: 0.10.0
libtpu: 0.0.40
codegen_flags: <defaults>
</compile_context>

<pallas_src>
import functools

import jax
import jax.numpy as jnp
from jax.experimental import pallas as pl
from jax.experimental.pallas import tpu as pltpu

_EPS = 1e-5

# Full-f32 MXU dots (explicit, so accuracy does not depend on default precision).
_dot = functools.partial(jnp.dot, preferred_element_type=jnp.float32,
                         precision=jax.lax.Precision.HIGHEST)


def _bn_relu(h, gamma, beta, eps=_EPS):
    """Training-mode BatchNorm1d + ReLU with a single fused XLU reduction.

    mean and E[h^2] are produced by one cross-sublane sum over the lane-concat
    [h | h*h] (2*hidden lanes still fit in one vreg row at these widths);
    gamma is folded into the rsqrt scale.  One-pass variance (E[h^2]-mean^2)
    is fine at unit-scale activations / 1e-4 tolerance.
    """
    hidden = h.shape[1]
    n_inv = 1.0 / h.shape[0]
    stats = jnp.sum(jnp.concatenate([h, h * h], axis=-1), axis=0,
                    keepdims=True) * n_inv
    mean = stats[:, :hidden]
    ex2 = stats[:, hidden:]
    var = jnp.maximum(ex2 - mean * mean, 0.0)
    scale = gamma * jax.lax.rsqrt(var + eps)
    return jnp.maximum((h - mean) * scale + beta, 0.0)


def decoder_kernel(z_ref, lab_ref, w1z_ref, w1l_ref, w2_ref, bn_ref,
                   wh_ref, bh_ref, mu_ref, std_ref, *, out_dim):
    z = z_ref[...].astype(jnp.float32)
    lab = lab_ref[...].astype(jnp.float32)

    # Layer 1: fused "concat + Linear" -> two MXU passes over the pre-split
    # halves of w1 (host-side split, so no alignment-dependent ref slicing).
    # Linear bias b1 omitted (cancelled by BN batch-mean subtraction; beta
    # provides the shift).
    h = _dot(z, w1z_ref[...]) + _dot(lab, w1l_ref[...])
    h = _bn_relu(h, bn_ref[0:1, :], bn_ref[1:2, :])

    # Layer 2: Linear (bias b2 likewise cancelled) -> BN -> ReLU.
    h = _dot(h, w2_ref[...])
    h = _bn_relu(h, bn_ref[2:3, :], bn_ref[3:4, :])

    # Fused output heads: one [hidden, 2*out] matmul, then static value slices
    # written straight to the two outputs (no wrapper-side slice copies).
    head = _dot(h, wh_ref[...]) + bh_ref[...]
    mu_ref[...] = head[:, :out_dim].astype(mu_ref.dtype)
    std_ref[...] = head[:, out_dim:].astype(std_ref.dtype)


def pack_params(p, latent_dim):
    """Host-side, one-time packing of the raw (PyTorch-layout) parameters."""
    return dict(
        w1_z=p["w1"][:latent_dim, :],                             # [latent, H]
        w1_lab=p["w1"][latent_dim:, :],                           # [label, H]
        w2=p["w2"],                                               # [H, H]
        bn=jnp.concatenate([p["g1"], p["be1"], p["g2"], p["be2"]], axis=0),  # [4, H]
        whead=jnp.concatenate([p["wmu"], p["wstd"]], axis=1),     # [H, 2*out]
        bhead=jnp.concatenate([p["bmu"], p["bstd"]], axis=1),     # [1, 2*out]
    )


def decoder_forward_calls(z, label, packed):
    """N stacked forward calls in one pallas_call.

    z: [N, B, latent], label: [N, B, label_dim].
    Returns (mu_x, std_x), each [N, B, output_dim].  Weights stay VMEM-resident
    across the grid (constant index_map); BN statistics are per call.
    """
    n_calls, batch, _ = z.shape
    two_out = packed["whead"].shape[1]
    out_dim = two_out // 2

    def per_call(i):          # activations / outputs advance with the call index
        return (i, 0, 0)

    def resident(i):          # weights: constant block index -> fetched once
        return (0, 0)

    def act_spec(feat):       # leading call axis squeezed out of the kernel ref
        return pl.BlockSpec((None, batch, feat), per_call)

    def w_spec(arr):
        return pl.BlockSpec(arr.shape, resident)

    in_specs = [
        act_spec(z.shape[-1]),
        act_spec(label.shape[-1]),
        w_spec(packed["w1_z"]),
        w_spec(packed["w1_lab"]),
        w_spec(packed["w2"]),
        w_spec(packed["bn"]),
        w_spec(packed["whead"]),
        w_spec(packed["bhead"]),
    ]
    out_specs = (act_spec(out_dim), act_spec(out_dim))
    out_shape = (jax.ShapeDtypeStruct((n_calls, batch, out_dim), jnp.float32),
                 jax.ShapeDtypeStruct((n_calls, batch, out_dim), jnp.float32))

    mu, std = pl.pallas_call(
        functools.partial(decoder_kernel, out_dim=out_dim),
        grid=(n_calls,),
        in_specs=in_specs,
        out_specs=out_specs,
        out_shape=out_shape,
        # Calls are independent -> shard across TensorCores on v7x megacore.
        compiler_params=pltpu.CompilerParams(
            dimension_semantics=("parallel",)),
    )(z, label, packed["w1_z"], packed["w1_lab"], packed["w2"],
      packed["bn"], packed["whead"], packed["bhead"])
    return mu, std


def decoder_forward(z, label, packed):
    """Single forward call. z: [B, latent], label: [B, label_dim]."""
    mu, std = decoder_forward_calls(z[None], label[None], packed)
    return mu[0], std[0]


def init_params(key, latent_dim, label_dim, hidden_dim, output_dim):
    """Deterministic synthetic init mimicking nn.Linear's U(-1/sqrt(fan_in), ...)."""
    d_in = latent_dim + label_dim
    ks = jax.random.split(key, 8)

    def lin(kw, kb, fan_in, fan_out):
        bound = 1.0 / jnp.sqrt(fan_in)
        w = jax.random.uniform(kw, (fan_in, fan_out), jnp.float32, -bound, bound)
        b = jax.random.uniform(kb, (1, fan_out), jnp.float32, -bound, bound)
        return w, b

    w1, b1 = lin(ks[0], ks[1], d_in, hidden_dim)
    w2, b2 = lin(ks[2], ks[3], hidden_dim, hidden_dim)
    wmu, bmu = lin(ks[4], ks[5], hidden_dim, output_dim)
    wstd, bstd = lin(ks[6], ks[7], hidden_dim, output_dim)

    return dict(
        w1=w1, b1=b1,
        g1=jnp.ones((1, hidden_dim), jnp.float32),
        be1=jnp.zeros((1, hidden_dim), jnp.float32),
        w2=w2, b2=b2,
        g2=jnp.ones((1, hidden_dim), jnp.float32),
        be2=jnp.zeros((1, hidden_dim), jnp.float32),
        wmu=wmu, bmu=bmu, wstd=wstd, bstd=bstd,
    )


def _reference(z, label, p, eps=_EPS):
    """Pure-JAX reference matching the PyTorch module's train-mode forward."""
    dot = functools.partial(jnp.dot, precision=jax.lax.Precision.HIGHEST)
    x = jnp.concatenate([z, label], axis=-1)

    def bn_relu(h, g, b):
        m = jnp.mean(h, axis=0, keepdims=True)
        v = jnp.mean((h - m) ** 2, axis=0, keepdims=True)
        return jnp.maximum((h - m) / jnp.sqrt(v + eps) * g + b, 0.0)

    h = bn_relu(dot(x, p["w1"]) + p["b1"], p["g1"], p["be1"])
    h = bn_relu(dot(h, p["w2"]) + p["b2"], p["g2"], p["be2"])
    return dot(h, p["wmu"]) + p["bmu"], dot(h, p["wstd"]) + p["bstd"]


if __name__ == "__main__":
    # Small shapes consistent with the module's forward.
    batch, latent_dim, label_dim, hidden_dim, output_dim = 8, 16, 8, 32, 16

    key = jax.random.PRNGKey(0)
    kz, kl, kp = jax.random.split(key, 3)
    params = init_params(kp, latent_dim, label_dim, hidden_dim, output_dim)
    packed = pack_params(params, latent_dim)  # one-time host-side weight packing

    # TODO(synk): BatchNorm running_mean/running_var updates (a training-time
    # side effect of nn.BatchNorm1d) are not tracked; forward math matches
    # PyTorch .train() mode.  The b1/b2 bias elimination is only valid for
    # train-mode BN (batch-mean subtraction); an eval-mode variant would need
    # the biases and running stats.

    # --- single forward call ------------------------------------------------
    z = jax.random.normal(kz, (batch, latent_dim), jnp.float32)
    label = jax.random.normal(kl, (batch, label_dim), jnp.float32)
    mu_x, std_x = decoder_forward(z, label, packed)
    jax.block_until_ready((mu_x, std_x))

    mu_ref, std_ref = _reference(z, label, params)
    assert jnp.allclose(mu_x, mu_ref, atol=1e-4, rtol=1e-4)
    assert jnp.allclose(std_x, std_ref, atol=1e-4, rtol=1e-4)

    # --- many forward calls, one launch (resident weights, parallel grid) ---
    n_calls = 4
    kz2, kl2 = jax.random.split(jax.random.PRNGKey(1), 2)
    z_stack = jax.random.normal(kz2, (n_calls, batch, latent_dim), jnp.float32)
    lab_stack = jax.random.normal(kl2, (n_calls, batch, label_dim), jnp.float32)
    mu_s, std_s = decoder_forward_calls(z_stack, lab_stack, packed)
    jax.block_until_ready((mu_s, std_s))

    for i in range(n_calls):
        mr, sr = _reference(z_stack[i], lab_stack[i], params)
        assert jnp.allclose(mu_s[i], mr, atol=1e-4, rtol=1e-4)
        assert jnp.allclose(std_s[i], sr, atol=1e-4, rtol=1e-4)

    print("KERNEL_OK")
</pallas_src>

<mosaic_0001>
module attributes {stable_mosaic.version = 11 : i64} {
  func.func @decoder_kernel(%arg0: i32, %arg1: memref<1x8x16xf32, #tpu.memory_space<vmem>>, %arg2: memref<1x8x8xf32, #tpu.memory_space<vmem>>, %arg3: memref<16x32xf32, #tpu.memory_space<vmem>>, %arg4: memref<8x32xf32, #tpu.memory_space<vmem>>, %arg5: memref<32x32xf32, #tpu.memory_space<vmem>>, %arg6: memref<4x32xf32, #tpu.memory_space<vmem>>, %arg7: memref<32x32xf32, #tpu.memory_space<vmem>>, %arg8: memref<1x32xf32, #tpu.memory_space<vmem>>, %arg9: memref<1x8x16xf32, #tpu.memory_space<vmem>>, %arg10: memref<1x8x16xf32, #tpu.memory_space<vmem>>) attributes {dimension_semantics = [#tpu.dimension_semantics<parallel>], iteration_bounds = array<i64: 1>, scalar_prefetch = 0 : i64, scratch_operands = 0 : i64, tpu.core_type = #tpu.core_type<tc>, window_params = [{transform_indices = @transform_0, window_bounds = array<i64: 1, 8, 16>}, {transform_indices = @transform_1, window_bounds = array<i64: 1, 8, 8>}, {pipeline_mode = #tpu.pipeline_mode<synchronous>, transform_indices = @transform_2, window_bounds = array<i64: 16, 32>}, {pipeline_mode = #tpu.pipeline_mode<synchronous>, transform_indices = @transform_3, window_bounds = array<i64: 8, 32>}, {pipeline_mode = #tpu.pipeline_mode<synchronous>, transform_indices = @transform_4, window_bounds = array<i64: 32, 32>}, {pipeline_mode = #tpu.pipeline_mode<synchronous>, transform_indices = @transform_5, window_bounds = array<i64: 4, 32>}, {pipeline_mode = #tpu.pipeline_mode<synchronous>, transform_indices = @transform_6, window_bounds = array<i64: 32, 32>}, {pipeline_mode = #tpu.pipeline_mode<synchronous>, transform_indices = @transform_7, window_bounds = array<i64: 1, 32>}, {transform_indices = @transform_8, window_bounds = array<i64: 1, 8, 16>}, {transform_indices = @transform_9, window_bounds = array<i64: 1, 8, 16>}]} {
    %c0 = arith.constant 0 : index
    %c0_0 = arith.constant 0 : index
    %c0_1 = arith.constant 0 : index
    %0 = vector.load %arg1[%c0, %c0_0, %c0_1] : memref<1x8x16xf32, #tpu.memory_space<vmem>>, vector<1x8x16xf32>
    %1 = vector.shape_cast %0 : vector<1x8x16xf32> to vector<8x16xf32>
    %c0_2 = arith.constant 0 : index
    %c0_3 = arith.constant 0 : index
    %c0_4 = arith.constant 0 : index
    %2 = vector.load %arg2[%c0_2, %c0_3, %c0_4] : memref<1x8x8xf32, #tpu.memory_space<vmem>>, vector<1x8x8xf32>
    %3 = vector.shape_cast %2 : vector<1x8x8xf32> to vector<8x8xf32>
    %c0_5 = arith.constant 0 : index
    %c0_6 = arith.constant 0 : index
    %4 = vector.load %arg3[%c0_5, %c0_6] : memref<16x32xf32, #tpu.memory_space<vmem>>, vector<16x32xf32>
    %cst = arith.constant dense<0.000000e+00> : vector<8x32xf32>
    %5 = tpu.matmul %1, %4, %cst {dimension_numbers = #tpu.dot_dimension_numbers<[1], [0], [0], [1], [0, 0, 1, 1], [], []>, precision = #tpu.contract_precision<fp32>} : vector<8x16xf32>, vector<16x32xf32>, vector<8x32xf32> -> vector<8x32xf32>
    %c0_7 = arith.constant 0 : index
    %c0_8 = arith.constant 0 : index
    %6 = vector.load %arg4[%c0_7, %c0_8] : memref<8x32xf32, #tpu.memory_space<vmem>>, vector<8x32xf32>
    %cst_9 = arith.constant dense<0.000000e+00> : vector<8x32xf32>
    %7 = tpu.matmul %3, %6, %cst_9 {dimension_numbers = #tpu.dot_dimension_numbers<[1], [0], [0], [1], [0, 0, 1, 1], [], []>, precision = #tpu.contract_precision<fp32>} : vector<8x8xf32>, vector<8x32xf32>, vector<8x32xf32> -> vector<8x32xf32>
    %8 = arith.addf %5, %7 : vector<8x32xf32>
    %c0_10 = arith.constant 0 : index
    %c0_11 = arith.constant 0 : index
    %9 = vector.load %arg6[%c0_10, %c0_11] : memref<4x32xf32, #tpu.memory_space<vmem>>, vector<1x32xf32>
    %c1 = arith.constant 1 : index
    %c0_12 = arith.constant 0 : index
    %10 = vector.load %arg6[%c1, %c0_12] : memref<4x32xf32, #tpu.memory_space<vmem>>, vector<1x32xf32>
    %11 = arith.mulf %8, %8 : vector<8x32xf32>
    %12 = tpu.concatenate %8, %11 in 1 : vector<8x32xf32>, vector<8x32xf32> -> vector<8x64xf32>
    %cst_13 = arith.constant dense<0.000000e+00> : vector<64xf32>
    %13 = vector.multi_reduction <add>, %12, %cst_13 [0] : vector<8x64xf32> to vector<64xf32>
    %14 = vector.shape_cast %13 : vector<64xf32> to vector<1x64xf32>
    %cst_14 = arith.constant 1.250000e-01 : f32
    %15 = vector.broadcast %cst_14 : f32 to vector<1x64xf32>
    %16 = arith.mulf %14, %15 : vector<1x64xf32>
    %17 = vector.extract_strided_slice %16 {offsets = [0, 0], sizes = [1, 32], strides = [1, 1]} : vector<1x64xf32> to vector<1x32xf32>
    %18 = vector.extract_strided_slice %16 {offsets = [0, 32], sizes = [1, 32], strides = [1, 1]} : vector<1x64xf32> to vector<1x32xf32>
    %19 = arith.mulf %17, %17 : vector<1x32xf32>
    %20 = arith.subf %18, %19 : vector<1x32xf32>
    %cst_15 = arith.constant 0.000000e+00 : f32
    %21 = vector.broadcast %cst_15 : f32 to vector<1x32xf32>
    %22 = arith.maximumf %20, %21 : vector<1x32xf32>
    %cst_16 = arith.constant 9.99999974E-6 : f32
    %23 = vector.broadcast %cst_16 : f32 to vector<1x32xf32>
    %24 = arith.addf %22, %23 : vector<1x32xf32>
    %25 = math.rsqrt %24 : vector<1x32xf32>
    %26 = arith.mulf %9, %25 : vector<1x32xf32>
    %27 = vector.broadcast %17 : vector<1x32xf32> to vector<8x32xf32>
    %28 = arith.subf %8, %27 : vector<8x32xf32>
    %29 = vector.broadcast %26 : vector<1x32xf32> to vector<8x32xf32>
    %30 = arith.mulf %28, %29 : vector<8x32xf32>
    %31 = vector.broadcast %10 : vector<1x32xf32> to vector<8x32xf32>
    %32 = arith.addf %30, %31 : vector<8x32xf32>
    %cst_17 = arith.constant 0.000000e+00 : f32
    %33 = vector.broadcast %cst_17 : f32 to vector<8x32xf32>
    %34 = arith.maximumf %32, %33 : vector<8x32xf32>
    %c0_18 = arith.constant 0 : index
    %c0_19 = arith.constant 0 : index
    %35 = vector.load %arg5[%c0_18, %c0_19] : memref<32x32xf32, #tpu.memory_space<vmem>>, vector<32x32xf32>
    %cst_20 = arith.constant dense<0.000000e+00> : vector<8x32xf32>
    %36 = tpu.matmul %34, %35, %cst_20 {dimension_numbers = #tpu.dot_dimension_numbers<[1], [0], [0], [1], [0, 0, 1, 1], [], []>, precision = #tpu.contract_precision<fp32>} : vector<8x32xf32>, vector<32x32xf32>, vector<8x32xf32> -> vector<8x32xf32>
    %c2 = arith.constant 2 : index
    %c0_21 = arith.constant 0 : index
    %37 = vector.load %arg6[%c2, %c0_21] : memref<4x32xf32, #tpu.memory_space<vmem>>, vector<1x32xf32>
    %c3 = arith.constant 3 : index
    %c0_22 = arith.constant 0 : index
    %38 = vector.load %arg6[%c3, %c0_22] : memref<4x32xf32, #tpu.memory_space<vmem>>, vector<1x32xf32>
    %39 = arith.mulf %36, %36 : vector<8x32xf32>
    %40 = tpu.concatenate %36, %39 in 1 : vector<8x32xf32>, vector<8x32xf32> -> vector<8x64xf32>
    %cst_23 = arith.constant dense<0.000000e+00> : vector<64xf32>
    %41 = vector.multi_reduction <add>, %40, %cst_23 [0] : vector<8x64xf32> to vector<64xf32>
    %42 = vector.shape_cast %41 : vector<64xf32> to vector<1x64xf32>
    %cst_24 = arith.constant 1.250000e-01 : f32
    %43 = vector.broadcast %cst_24 : f32 to vector<1x64xf32>
    %44 = arith.mulf %42, %43 : vector<1x64xf32>
    %45 = vector.extract_strided_slice %44 {offsets = [0, 0], sizes = [1, 32], strides = [1, 1]} : vector<1x64xf32> to vector<1x32xf32>
    %46 = vector.extract_strided_slice %44 {offsets = [0, 32], sizes = [1, 32], strides = [1, 1]} : vector<1x64xf32> to vector<1x32xf32>
    %47 = arith.mulf %45, %45 : vector<1x32xf32>
    %48 = arith.subf %46, %47 : vector<1x32xf32>
    %cst_25 = arith.constant 0.000000e+00 : f32
    %49 = vector.broadcast %cst_25 : f32 to vector<1x32xf32>
    %50 = arith.maximumf %48, %49 : vector<1x32xf32>
    %cst_26 = arith.constant 9.99999974E-6 : f32
    %51 = vector.broadcast %cst_26 : f32 to vector<1x32xf32>
    %52 = arith.addf %50, %51 : vector<1x32xf32>
    %53 = math.rsqrt %52 : vector<1x32xf32>
    %54 = arith.mulf %37, %53 : vector<1x32xf32>
    %55 = vector.broadcast %45 : vector<1x32xf32> to vector<8x32xf32>
    %56 = arith.subf %36, %55 : vector<8x32xf32>
    %57 = vector.broadcast %54 : vector<1x32xf32> to vector<8x32xf32>
    %58 = arith.mulf %56, %57 : vector<8x32xf32>
    %59 = vector.broadcast %38 : vector<1x32xf32> to vector<8x32xf32>
    %60 = arith.addf %58, %59 : vector<8x32xf32>
    %cst_27 = arith.constant 0.000000e+00 : f32
    %61 = vector.broadcast %cst_27 : f32 to vector<8x32xf32>
    %62 = arith.maximumf %60, %61 : vector<8x32xf32>
    %c0_28 = arith.constant 0 : index
    %c0_29 = arith.constant 0 : index
    %63 = vector.load %arg7[%c0_28, %c0_29] : memref<32x32xf32, #tpu.memory_space<vmem>>, vector<32x32xf32>
    %cst_30 = arith.constant dense<0.000000e+00> : vector<8x32xf32>
    %64 = tpu.matmul %62, %63, %cst_30 {dimension_numbers = #tpu.dot_dimension_numbers<[1], [0], [0], [1], [0, 0, 1, 1], [], []>, precision = #tpu.contract_precision<fp32>} : vector<8x32xf32>, vector<32x32xf32>, vector<8x32xf32> -> vector<8x32xf32>
    %c0_31 = arith.constant 0 : index
    %c0_32 = arith.constant 0 : index
    %65 = vector.load %arg8[%c0_31, %c0_32] : memref<1x32xf32, #tpu.memory_space<vmem>>, vector<1x32xf32>
    %66 = vector.broadcast %65 : vector<1x32xf32> to vector<8x32xf32>
    %67 = arith.addf %64, %66 : vector<8x32xf32>
    %68 = vector.extract_strided_slice %67 {offsets = [0, 0], sizes = [8, 16], strides = [1, 1]} : vector<8x32xf32> to vector<8x16xf32>
    %c0_33 = arith.constant 0 : index
    %c0_34 = arith.constant 0 : index
    %c0_35 = arith.constant 0 : index
    %69 = vector.load %arg9[%c0_33, %c0_34, %c0_35] : memref<1x8x16xf32, #tpu.memory_space<vmem>>, vector<1x8x16xf32>
    %70 = vector.shape_cast %69 : vector<1x8x16xf32> to vector<8x16xf32>
    %71 = vector.shape_cast %68 : vector<8x16xf32> to vector<1x8x16xf32>
    tpu.vector_store %arg9[%c0_33, %c0_34, %c0_35], %71 {strides = array<i32>} : memref<1x8x16xf32, #tpu.memory_space<vmem>>, vector<1x8x16xf32>,
    %72 = vector.extract_strided_slice %67 {offsets = [0, 16], sizes = [8, 16], strides = [1, 1]} : vector<8x32xf32> to vector<8x16xf32>
    %c0_36 = arith.constant 0 : index
    %c0_37 = arith.constant 0 : index
    %c0_38 = arith.constant 0 : index
    %73 = vector.load %arg10[%c0_36, %c0_37, %c0_38] : memref<1x8x16xf32, #tpu.memory_space<vmem>>, vector<1x8x16xf32>
    %74 = vector.shape_cast %73 : vector<1x8x16xf32> to vector<8x16xf32>
    %75 = vector.shape_cast %72 : vector<8x16xf32> to vector<1x8x16xf32>
    tpu.vector_store %arg10[%c0_36, %c0_37, %c0_38], %75 {strides = array<i32>} : memref<1x8x16xf32, #tpu.memory_space<vmem>>, vector<1x8x16xf32>,
    return
  }
  func.func @transform_0(%arg0: i32) -> (i32, i32, i32) {
    %c0_i32 = arith.constant 0 : i32
    %c0_i32_0 = arith.constant 0 : i32
    %c0_i32_1 = arith.constant 0 : i32
    return %arg0, %c0_i32, %c0_i32_0 : i32, i32, i32
  }
  func.func @transform_1(%arg0: i32) -> (i32, i32, i32) {
    %c0_i32 = arith.constant 0 : i32
    %c0_i32_0 = arith.constant 0 : i32
    %c0_i32_1 = arith.constant 0 : i32
    return %arg0, %c0_i32, %c0_i32_0 : i32, i32, i32
  }
  func.func @transform_2(%arg0: i32) -> (i32, i32) {
    %c0_i32 = arith.constant 0 : i32
    %c0_i32_0 = arith.constant 0 : i32
    %c0_i32_1 = arith.constant 0 : i32
    return %c0_i32, %c0_i32_0 : i32, i32
  }
  func.func @transform_3(%arg0: i32) -> (i32, i32) {
    %c0_i32 = arith.constant 0 : i32
    %c0_i32_0 = arith.constant 0 : i32
    %c0_i32_1 = arith.constant 0 : i32
    return %c0_i32, %c0_i32_0 : i32, i32
  }
  func.func @transform_4(%arg0: i32) -> (i32, i32) {
    %c0_i32 = arith.constant 0 : i32
    %c0_i32_0 = arith.constant 0 : i32
    %c0_i32_1 = arith.constant 0 : i32
    return %c0_i32, %c0_i32_0 : i32, i32
  }
  func.func @transform_5(%arg0: i32) -> (i32, i32) {
    %c0_i32 = arith.constant 0 : i32
    %c0_i32_0 = arith.constant 0 : i32
    %c0_i32_1 = arith.constant 0 : i32
    return %c0_i32, %c0_i32_0 : i32, i32
  }
  func.func @transform_6(%arg0: i32) -> (i32, i32) {
    %c0_i32 = arith.constant 0 : i32
    %c0_i32_0 = arith.constant 0 : i32
    %c0_i32_1 = arith.constant 0 : i32
    return %c0_i32, %c0_i32_0 : i32, i32
  }
  func.func @transform_7(%arg0: i32) -> (i32, i32) {
    %c0_i32 = arith.constant 0 : i32
    %c0_i32_0 = arith.constant 0 : i32
    %c0_i32_1 = arith.constant 0 : i32
    return %c0_i32, %c0_i32_0 : i32, i32
  }
  func.func @transform_8(%arg0: i32) -> (i32, i32, i32) {
    %c0_i32 = arith.constant 0 : i32
    %c0_i32_0 = arith.constant 0 : i32
    %c0_i32_1 = arith.constant 0 : i32
    return %arg0, %c0_i32, %c0_i32_0 : i32, i32, i32
  }
  func.func @transform_9(%arg0: i32) -> (i32, i32, i32) {
    %c0_i32 = arith.constant 0 : i32
    %c0_i32_0 = arith.constant 0 : i32
    %c0_i32_1 = arith.constant 0 : i32
    return %arg0, %c0_i32, %c0_i32_0 : i32, i32, i32
  }
}

</mosaic_0001>

<bundles_post_ra>
// kernel: tpu_custom_call.1
= control target key start
LH: loop header
LB: loop body
LE: loop exit
PB: predicated region body
PF: predicated region fallthrough
CT: control target
= control target key end

     0   :  { %15 = vsyncpa [#allocation3], 0  ;;  %s1326_s0 = inlined_call_operand.hbm [shape: f32[1,8,16], index: 0, kind: input, shape index: {}]   ;;  %s1327_s1 = inlined_call_operand.hbm [shape: f32[1,8,8], index: 1, kind: input, shape index: {}]   ;;  %s1328_s2 = inlined_call_operand.hbm [shape: f32[16,32], index: 2, kind: input, shape index: {}]   ;;  %s1329_s3 = inlined_call_operand.hbm [shape: f32[8,32], index: 3, kind: input, shape index: {}]   ;;  %s1330_s4 = inlined_call_operand.hbm [shape: f32[32,32], index: 4, kind: input, shape index: {}]   ;;  %s1331_s5 = inlined_call_operand.vmem [shape: f32[4,32], index: 5, kind: input, shape index: {}]   ;;  %s1332_s6 = inlined_call_operand.hbm [shape: f32[32,32], index: 6, kind: input, shape index: {}]   ;;  %s1333_s7 = inlined_call_operand.vmem [shape: f32[1,32], index: 7, kind: input, shape index: {}]   ;;  %s1334_s8 = inlined_call_operand.hbm [shape: f32[1,8,16], index: 8, kind: output, shape index: {0}]   ;;  %s1335_s9 = inlined_call_operand.hbm [shape: f32[1,8,16], index: 9, kind: output, shape index: {1}]  }
   0x1   :  { %16 = vsyncpa [#allocation6], 0 }
   0x2   :  { %17 = vsyncpa [#allocation9], 0 }
   0x3   :  { %18 = vsyncpa [#allocation12], 0 }
   0x4   :  { %19 = vsyncpa [#allocation4], 0  ;;  %s37_s11 = sshll.u32 %s1327_s1, 4  ;;  %s38_s11 = int_to_ptr.hbm [resolvable:$true] %s37_s11 }
   0x5   :  { %20 = vsyncpa [#allocation15], 0  ;;  %s1185_s12 = smov [#allocation5]   ;;  %s61_s16 = sshll.u32 %s1329_s3, 4  ;;  %s62_s16 = int_to_ptr.hbm [resolvable:$true] %s61_s16 }
   0x6   :  { %s39_s13 = sshll.u32 %s1185_s12, 4  ;;  %s1186_s17 = smov [#allocation8]   ;;  %s40_s13 = int_to_ptr.vmem [resolvable:$true] %s39_s13 }
   0x7   :  { %42 = dma.hbm_to_vmem [thread:$0]  %s38_s11, 128, %s40_s13, [#allocation6]  }
   0x8   :  { %s63_s18 = sshll.u32 %s1186_s17, 4  ;;  %s26_s21 = sshll.u32 %s1326_s0, 4  ;;  %s64_s18 = int_to_ptr.vmem [resolvable:$true] %s63_s18  ;;  %s27_s21 = int_to_ptr.hbm [resolvable:$true] %s26_s21 }
   0x9   :  { %66 = dma.hbm_to_vmem [thread:$0]  %s62_s16, 128, %s64_s18, [#allocation9]  }
   0xa   :  { %s47_s23 = sshll.u32 %s1328_s2, 4  ;;  %s1187_s24 = smov [#allocation2]   ;;  %s48_s23 = int_to_ptr.hbm [resolvable:$true] %s47_s23 }
   0xb   :  { %s28_s25 = sshll.u32 %s1187_s24, 4  ;;  %s1188_s3 = smov [#allocation7]   ;;  %s29_s25 = int_to_ptr.vmem [resolvable:$true] %s28_s25 }
   0xc   :  { %31 = dma.hbm_to_vmem [thread:$0]  %s27_s21, 128, %s29_s25, [#allocation3]  }
   0xd   :  { %s49_s26 = sshll.u32 %s1188_s3, 4  ;;  %s1189_s27 = smov 128   ;;  %s50_s26 = int_to_ptr.vmem [resolvable:$true] %s49_s26 }
   0xe   :  { %s1190_s28 = smov 8   ;;  %s71_s30 = sshll.u32 %s1330_s4, 4  ;;  %s72_s30 = int_to_ptr.hbm [resolvable:$true] %s71_s30 }
   0xf   :  { %55 = dma.hbm_to_vmem [thread:$0]  %s48_s23, 256, %s50_s26, [#allocation6], %s1189_s27, %s1189_s27, %s1190_s28  }
  0x10   :  { %s1191_s10 = smov [#allocation10]   ;;  %s86_s13 = sshll.u32 %s1332_s6, 4  ;;  %s87_s13 = int_to_ptr.hbm [resolvable:$true] %s86_s13 }
  0x11   :  { %s73_s11 = sshll.u32 %s1191_s10, 4  ;;  %s1192_s14 = smov [#allocation11]   ;;  %s74_s11 = int_to_ptr.vmem [resolvable:$true] %s73_s11 }
  0x12   :  { %79 = dma.hbm_to_vmem [thread:$0]  %s72_s30, 512, %s74_s11, [#allocation9], %s1189_s27, %s1189_s27, %s1190_s28  }
  0x13   :  { %s88_s15 = sshll.u32 %s1192_s14, 4  ;;  %s89_s15 = int_to_ptr.vmem [resolvable:$true] %s88_s15 }
  0x14   :  { %94 = dma.hbm_to_vmem [thread:$0]  %s87_s13, 512, %s89_s15, [#allocation12], %s1189_s27, %s1189_s27, %s1190_s28  }
  0x15   :  { %1173 = dma.done.wait [#allocation3], 128  }
  0x16   :  { %1174 = vsyncadd [#allocation3], 4294967168 }
  0x17   :  { %1175 = dma.done.wait [#allocation6], 384  }
  0x18   :  { %1176 = vsyncadd [#allocation6], 4294966912 }
  0x19   :  { %1177 = dma.done.wait [#allocation9], 640  }
  0x1a   :  { %1178 = vsyncadd [#allocation9], 4294966656 }
  0x1b   :  { %1179 = dma.done.wait [#allocation12], 512  }
  0x1c   :  { %1180 = vsyncadd [#allocation12], 4294966784  ;;  %vm126_vm0 = vcmask 64512   ;;  %vm276_vm1 = vcmask 130048   ;;  %v125_v0 = vld [vmem:[#allocation8] sm:$0xff]  ;;  %v122_v1 = vld [vmem:[#allocation5] sm:$0xff] }
  0x1d   :  { %v124_v2 = vld [vmem:[#allocation7 + $0x8] sm:$0xff]  ;;  %v145_v3 = vand.u32 4294901760, %v125_v0  ;;  %v128_v4 = vsel %vm126_vm0, %v122_v1, 0  ;;  %v123_v6 = vld [vmem:[#allocation7] sm:$0xff]  ;;  %v121_v7 = vld [vmem:[#allocation2] sm:$0xff]  ;;  %s1193_s4 = smov 32  }
  0x1e   :  { %v294_v5 = vand.u32 4294901760, %v124_v2  ;;  %v147_v8 = vand.u32 4294901760, %v128_v4  ;;  %v296_v9 = vand.u32 4294901760, %v123_v6  ;;  %v278_v10 = vsel %vm276_vm1, %v121_v7, 0  ;;  %s1194_s6 = smov 96   ;;  %s932_s27 = sshll.u32 %s1334_s8, 4  ;;  %s933_s27 = int_to_ptr.hbm [resolvable:$true] %s932_s27 }
  0x1f   :  { %v172_v11 = vsub.f32 %v125_v0, %v145_v3  ;;  %222 = vmatpush.msra.mxu3 %v145_v3  ;;  %146 = vmatpush.msra.mxu0 %v145_v3  ;;  %v298_v13 = vand.u32 4294901760, %v278_v10  ;;  %vm446_vm2 = vcmask 261120   ;;  %vm448_vm3 = vcmask 523264   ;;  %s1197_s28 = smov [#allocation14]   ;;  %s943_s10 = sshll.u32 %s1335_s9, 4  ;;  %s944_s10 = int_to_ptr.hbm [resolvable:$true] %s943_s10 }
  0x20   :  { %v322_v12 = vsub.f32 %v124_v2, %v294_v5  ;;  %v148_v14 = vsub.f32 %v128_v4, %v147_v8  ;;  %v328_v15 = vsub.f32 %v123_v6, %v296_v9  ;;  %s941_s29 = sshll.u32 %s1197_s28, 4  ;;  %s942_s29 = int_to_ptr.vmem [resolvable:$true] %s941_s29 }
  0x21   :  { %199 = vmatpush.msra.mxu2 %v172_v11  ;;  %v173_v16 = vand.u32 4294901760, %v172_v11  ;;  %v299_v18 = vsub.f32 %v278_v10, %v298_v13 }
  0x22   :  { %v323_v17 = vand.u32 4294901760, %v322_v12  ;;  %202 = vmatmul.f32.vlgmr.msra.gmra.mxu2 %v148_v14  ;;  %v149_v19 = vand.u32 4294901760, %v148_v14  ;;  %v329_v20 = vand.u32 4294901760, %v328_v15 }
  0x23   :  { %295 = vmatpush.msrb.mxu2 %v294_v5  ;;  %v174_v21 = vsub.f32 %v172_v11, %v173_v16  ;;  %248 = vmatpush.msrb.mxu0 %v173_v16  ;;  %v300_v23 = vand.u32 4294901760, %v299_v18  ;;  %v488_v16 = vld [vmem:[#allocation10 + $0x10] sm:$0xff] }
  0x24   :  { %v324_v22 = vsub.f32 %v322_v12, %v323_v17  ;;  %226 = vmatmul.f32.vlgmr.msra.gmra.mxu3 %v149_v19  ;;  %v150_v24 = vsub.f32 %v148_v14, %v149_v19  ;;  %v330_v25 = vsub.f32 %v328_v15, %v329_v20  ;;  %v489_v14 = vld [vmem:[#allocation10 + $0x18] sm:$0xff]  ;;  %v487_v19 = vld [vmem:[#allocation10 + $0x8] sm:$0xff] }
  0x25   :  { %v175_v26 = vand.u32 4294901760, %v174_v21  ;;  %297 = vmatpush.msrb.mxu2 %v296_v9  ;;  %v301_v28 = vsub.f32 %v299_v18, %v300_v23 }
  0x26   :  { %v325_v27 = vand.u32 4294901760, %v324_v22  ;;  %v151_v29 = vand.u32 4294901760, %v150_v24  ;;  %v331_v30 = vand.u32 4294901760, %v330_v25  ;;  %v509_v22 = vand.u32 4294901760, %v487_v19 }
  0x27   :  { %406 = vmatpush.msra.mxu2 %v323_v17  ;;  %176 = vmatpush.msra.mxu1 %v175_v26  ;;  %v302_v31 = vand.u32 4294901760, %v301_v28 }
  0x28   :  { %326 = vmatpush.msrb.mxu3 %v325_v27  ;;  %152 = vmatmul.f32.vlgmr.msra.gmra.mxu0 %v151_v29  ;;  %v547_v26 = vsub.f32 %v487_v19, %v509_v22 }
  0x29   :  { %178 = vmatmul.f32.vlgmr.msra.gmra.mxu1 %v147_v8  ;;  %354 = vmatpush.msra.mxu0 %v322_v12 }
  0x2a   :  { %270 = vmatpush.msrb.mxu1 %v145_v3  ;;  %332 = vmatpush.msrb.mxu3 %v331_v30  ;;  %v548_v30 = vand.u32 4294901760, %v547_v26 }
  0x2b   :  { %303 = vmatmul.f32.vlgmr.msrb.gmra.mxu2 %v302_v31  ;;  %357 = vmatpush.msra.mxu0 %v328_v15  ;;  %v505_v15 = vand.u32 4294901760, %v489_v14 }
  0x2c   :  { %431 = vmatpush.msra.mxu3 %v294_v5  ;;  %379 = vmatpush.msra.mxu1 %v294_v5 }
  0x2d   :  { %334 = vmatmul.f32.vlgmr.msrb.gmra.mxu3 %v298_v13  ;;  %410 = vmatpush.msra.mxu2 %v329_v20  ;;  %v535_v17 = vsub.f32 %v489_v14, %v505_v15 }
  0x2e   :  { %433 = vmatpush.msra.mxu3 %v296_v9  ;;  %381 = vmatpush.msra.mxu1 %v296_v9 }
  0x2f   :  { %v536_v20 = vand.u32 4294901760, %v535_v17  ;;  %577 = vmatpush.msrb.mxu2 %v535_v17 }
  0x30   :  { %250 = vmatmul.f32.vlgmr.msrb.gmra.mxu0 %v147_v8  ;;  %606 = vmatpush.msrb.mxu3 %v505_v15 }
  0x31   :  { %272 = vmatmul.f32.vlgmr.msrb.gmra.mxu1 %v147_v8  ;;  %506 = vmatpush.msrb.mxu0 %v505_v15  ;;  %v537_v24 = vsub.f32 %v535_v17, %v536_v20 }
  0x33   :  { %412 = vmatmul.f32.vlgmr.msra.gmra.mxu2 %v298_v13  ;;  %v538_v28 = vand.u32 4294901760, %v537_v24 }
  0x35   :  { %435 = vmatmul.f32.vlgmr.msra.gmra.mxu3 %v298_v13  ;;  %539 = vmatpush.msrb.mxu1 %v538_v28  ;;  %v724_v28 = vld [vmem:[#allocation11 + $0x8] sm:$0xff] }
  0x38   :  { %360 = vmatmul.f32.vlgmr.msra.gmra.mxu0 %v299_v18  ;;  %v507_v18 = vand.u32 4294901760, %v488_v16 }
  0x39   :  { %385 = vmatmul.f32.vlgmr.msra.gmra.mxu1 %v300_v23  ;;  %v486_v23 = vld [vmem:[#allocation10] sm:$0xff] }
  0x3a   :  { %v541_v21 = vsub.f32 %v488_v16, %v507_v18  ;;  %608 = vmatpush.msrb.mxu3 %v507_v18  ;;  %508 = vmatpush.msrb.mxu0 %v507_v18  ;;  %v511_v27 = vand.u32 4294901760, %v486_v23 }
  0x3c   :  { %v542_v25 = vand.u32 4294901760, %v541_v21  ;;  %580 = vmatpush.msrb.mxu2 %v541_v21  ;;  %610 = vmatpush.msrb.mxu3 %v509_v22  ;;  %v553_v31 = vsub.f32 %v486_v23, %v511_v27  ;;  %v726_v23 = vld [vmem:[#allocation11 + $0x18] sm:$0xff] }
  0x3d   :  { %510 = vmatpush.msrb.mxu0 %v509_v22  ;;  %v746_v24 = vand.u32 4294901760, %v726_v23 }
  0x3e   :  { %v543_v29 = vsub.f32 %v541_v21, %v542_v25  ;;  %583 = vmatpush.msrb.mxu2 %v547_v26  ;;  %612 = vmatpush.msrb.mxu3 %v511_v27 }
  0x3f   :  { %512 = vmatpush.msrb.mxu0 %v511_v27 }
  0x40   :  { %586 = vmatpush.msrb.mxu2 %v553_v31 }
  0x41   :  { %635 = vmatpush.msra.mxu0 %v536_v20 }
  0x42   :  { %747 = vmatpush.msra.mxu2 %v746_v24 }
  0x43   :  { %639 = vmatpush.msra.mxu0 %v542_v25  ;;  %v725_v25 = vld [vmem:[#allocation11 + $0x10] sm:$0xff] }
  0x45   :  { %643 = vmatpush.msra.mxu0 %v548_v30 }
  0xa5   :  { %v153_v32 = vpop.f32.mrf.mxu0  ;;  %v203_v35 = vpop.f32.mrf.mxu2 }
  0xa6   :  { %v179_v33 = vpop.f32.mrf.mxu1 }
  0xa7   :  { %v180_v34 = vadd.f32 %v179_v33, %v153_v32  ;;  %v227_v36 = vpop.f32.mrf.mxu3  ;;  %v544_v32 = vand.u32 4294901760, %v543_v29  ;;  %v549_v33 = vsub.f32 %v547_v26, %v548_v30  ;;  %v776_v26 = vsub.f32 %v726_v23, %v746_v24 }
  0xa9   :  { %v204_v37 = vadd.f32 %v203_v35, %v180_v34  ;;  %v554_v34 = vand.u32 4294901760, %v553_v31  ;;  %545 = vmatpush.msrb.mxu1 %v544_v32  ;;  %v550_v35 = vand.u32 4294901760, %v549_v33  ;;  %v777_v29 = vand.u32 4294901760, %v776_v26  ;;  %v723_v32 = vld [vmem:[#allocation11] sm:$0xff] }
  0xab   :  { %v228_v38 = vadd.f32 %v227_v36, %v204_v37  ;;  %v555_v36 = vsub.f32 %v553_v31, %v554_v34  ;;  %551 = vmatpush.msrb.mxu1 %v550_v35  ;;  %647 = vmatpush.msra.mxu0 %v554_v34  ;;  %v750_v31 = vand.u32 4294901760, %v724_v28  ;;  %v778_v33 = vsub.f32 %v776_v26, %v777_v29 }
  0xad   :  { %v251_v39 = vpop.f32.mrf.mxu0  ;;  %v556_v37 = vand.u32 4294901760, %v555_v36  ;;  %v788_v35 = vsub.f32 %v724_v28, %v750_v31  ;;  %v752_v36 = vand.u32 4294901760, %v723_v32 }
  0xae   :  { %v273_v40 = vpop.f32.mrf.mxu1  ;;  %v252_v41 = vadd.f32 %v251_v39, %v228_v38  ;;  %v304_v42 = vpop.f32.mrf.mxu2  ;;  %v439_v38 = vld [vmem:[%s1331_s5] sm:$0x1] }
  0xaf   :  { %557 = vmatpush.msrb.mxu1 %v556_v37  ;;  %v779_v37 = vand.u32 4294901760, %v778_v33 }
  0xb0   :  { %v335_v43 = vpop.f32.mrf.mxu3  ;;  %v274_v44 = vadd.f32 %v273_v40, %v252_v41 }
  0xb1   :  { %666 = vmatpush.msra.mxu1 %v505_v15  ;;  %780 = vmatpush.msra.mxu3 %v779_v37 }
  0xb2   :  { %v305_v45 = vadd.f32 %v304_v42, %v274_v44  ;;  %v974_v42 = vld [vmem:[%s1331_s5 + $0x1] ss:$0 sm:$0xff] }
  0xb3   :  { %668 = vmatpush.msra.mxu1 %v507_v18 }
  0xb4   :  { %v336_v46 = vadd.f32 %v335_v43, %v305_v45 }
  0xb5   :  { %v361_v47 = vpop.f32.mrf.mxu0  ;;  %670 = vmatpush.msra.mxu1 %v509_v22 }
  0xb6   :  { %v386_v48 = vpop.f32.mrf.mxu1  ;;  %v362_v49 = vadd.f32 %v361_v47, %v336_v46  ;;  %v413_v50 = vpop.f32.mrf.mxu2 }
  0xb7   :  { %672 = vmatpush.msra.mxu1 %v511_v27  ;;  %v748_v27 = vand.u32 4294901760, %v725_v25 }
  0xb8   :  { %v387_v51 = vadd.f32 %v386_v48, %v362_v49  ;;  %v436_v52 = vpop.f32.mrf.mxu3 }
  0xb9   :  { %v782_v30 = vsub.f32 %v725_v25, %v748_v27  ;;  %749 = vmatpush.msra.mxu2 %v748_v27 }
  0xba   :  { %v414_v53 = vadd.f32 %v413_v50, %v387_v51 }
  0xbb   :  { %v783_v34 = vand.u32 4294901760, %v782_v30  ;;  %751 = vmatpush.msra.mxu2 %v750_v31 }
  0xbc   :  { %v1267_v54 = vadd.f32 %v436_v52, %v414_v53 }
  0xbd   :  { %753 = vmatpush.msra.mxu2 %v752_v36 }
  0xbe   :  { %v441_v55 = vmul.f32 %v1267_v54, %v1267_v54 }
  0xc0   :  { %443 = vrot.lane.b32.xlu0 %v441_v55, %s1193_s4 }
 0x132   :  { %v444_v56 = vpop.permute.xlu0 %443 }
 0x133   :  { %v447_v57 = vsel %vm446_vm2, %v1267_v54, %v444_v56 }
 0x134   :  { %v449_v58 = vsel %vm448_vm3, %v447_v57, 0.0 }
 0x135   :  { %v450_v59 = vrot.slane %v449_v58, 4 }
 0x137   :  { %v451_v60 = vadd.f32 %v450_v59, %v449_v58 }
 0x139   :  { %v452_v61 = vrot.slane %v451_v60, 2 }
 0x13b   :  { %v453_v62 = vadd.f32 %v452_v61, %v451_v60 }
 0x13d   :  { %v454_v63 = vrot.slane %v453_v62, 1 }
 0x13f   :  { %v455_v0 = vadd.f32 %v454_v63, %v453_v62 }
 0x141   :  { %v1275_v1 = vmul.f32 0.125, %v455_v0 }
 0x143   :  { %v457_v2 = vmul.f32 %v1275_v1, %v1275_v1  ;;  %v480_v41 = vsub.f32 %v1267_v54, %v1275_v1 }
 0x145   :  { %459 = vrot.lane.b32.xlu0 %v457_v2, %s1193_s4 }
 0x1b7   :  { %v460_v3 = vpop.permute.xlu0 %459 }
 0x1b8   :  { %v462_v4 = vsub.f32 %v1275_v1, %v460_v3 }
 0x1ba   :  { %v463_v5 = vmax.f32 %v462_v4, 0.0 }
 0x1bc   :  { %v464_v6 = vadd.f32 1e-05, %v463_v5 }
 0x1be   :  { %977 = vrsqrt.f32 %v464_v6  ;;  %vm471_vm5 = vweird.f32 %v464_v6 }
 0x1c4   :  { %v978_v7 = vpop.eup %977 }
 0x1c5   :  { %v466_v8 = vmul.f32 %v978_v7, %v464_v6  ;;  %vm472_vm4 = vweird.f32 %v978_v7 }
 0x1c6   :  { %vm473_vm6 = vmor %vm471_vm5, %vm472_vm4 }
 0x1c7   :  { %v467_v9 = vmul.f32 %v978_v7, %v466_v8 }
 0x1c9   :  { %v468_v10 = vmul.f32 0.5, %v467_v9 }
 0x1cb   :  { %v469_v11 = vsub.f32 1.5, %v468_v10 }
 0x1cd   :  { %v470_v12 = vmul.f32 %v978_v7, %v469_v11 }
 0x1cf   :  { %v474_v13 = vsel %vm473_vm6, %v978_v7, %v470_v12 }
 0x1d0   :  { %476 = vrot.lane.b32.xlu1 %v474_v13, %s1194_s6 }
 0x242   :  { %v477_v39 = vpop.permute.xlu1 %476 }
 0x243   :  { %v479_v40 = vmul.f32 %v477_v39, %v439_v38  ;;  %v784_v38 = vsub.f32 %v782_v30, %v783_v34  ;;  %v789_v39 = vand.u32 4294901760, %v788_v35 }
 0x245   :  { %v481_v43 = vperm.slane %v479_v40, 0  ;;  %v794_v40 = vsub.f32 %v723_v32, %v752_v36 }
 0x247   :  { %v482_v44 = vmul.f32 %v481_v43, %v480_v41  ;;  %v785_v41 = vand.u32 4294901760, %v784_v38  ;;  %v795_v43 = vand.u32 4294901760, %v794_v40 }
 0x249   :  { %v484_v45 = vadd.f32 %v974_v42, %v482_v44  ;;  %v790_v42 = vsub.f32 %v788_v35, %v789_v39  ;;  %786 = vmatpush.msra.mxu3 %v785_v41 }
 0x24b   :  { %v485_v46 = vmax.f32 %v484_v45, 0.0  ;;  %v791_v44 = vand.u32 4294901760, %v790_v42  ;;  %v796_v45 = vsub.f32 %v794_v40, %v795_v43 }
 0x24d   :  { %v491_v47 = vsel %vm446_vm2, %v485_v46, 0  ;;  %792 = vmatpush.msra.mxu3 %v791_v44  ;;  %v797_v46 = vand.u32 4294901760, %v796_v45 }
 0x24e   :  { %v513_v48 = vand.u32 4294901760, %v491_v47 }
 0x24f   :  { %798 = vmatpush.msra.mxu3 %v797_v46 }
 0x250   :  { %559 = vmatmul.f32.vlgmr.msrb.gmra.mxu1 %v513_v48  ;;  %v514_v49 = vsub.f32 %v491_v47, %v513_v48  ;;  %v678_v47 = vld [vmem:[%s1331_s5 + $0x2] sm:$0x1] }
 0x251   :  { %847 = vmatpush.msrb.mxu1 %v746_v24 }
 0x252   :  { %589 = vmatmul.f32.vlgmr.msrb.gmra.mxu2 %v514_v49  ;;  %v515_v50 = vand.u32 4294901760, %v514_v49 }
 0x253   :  { %849 = vmatpush.msrb.mxu1 %v748_v27  ;;  %876 = vmatpush.msrb.mxu2 %v777_v29 }
 0x254   :  { %616 = vmatmul.f32.vlgmr.msrb.gmra.mxu3 %v515_v50  ;;  %v516_v51 = vsub.f32 %v514_v49, %v515_v50 }
 0x255   :  { %851 = vmatpush.msrb.mxu1 %v750_v31  ;;  %880 = vmatpush.msrb.mxu2 %v783_v34 }
 0x256   :  { %v517_v52 = vand.u32 4294901760, %v516_v51  ;;  %907 = vmatpush.msrb.mxu3 %v746_v24  ;;  %v975_v51 = vld [vmem:[%s1331_s5 + $0x3] ss:$0 sm:$0xff]  ;;  %s1195_s5 = smov [#allocation13]  }
 0x257   :  { %853 = vmatpush.msrb.mxu1 %v752_v36  ;;  %884 = vmatpush.msrb.mxu2 %v789_v39  ;;  %s930_s25 = sshll.u32 %s1195_s5, 4  ;;  %s931_s25 = int_to_ptr.vmem [resolvable:$true] %s930_s25 }
 0x258   :  { %518 = vmatmul.f32.vlgmr.msrb.gmra.mxu0 %v517_v52  ;;  %674 = vmatmul.f32.vlgmr.msra.gmra.mxu1 %v513_v48 }
 0x259   :  { %818 = vmatpush.msrb.mxu0 %v776_v26  ;;  %888 = vmatpush.msrb.mxu2 %v795_v43 }
 0x25a   :  { %909 = vmatpush.msrb.mxu3 %v748_v27 }
 0x25b   :  { %821 = vmatpush.msrb.mxu0 %v782_v30 }
 0x25c   :  { %911 = vmatpush.msrb.mxu3 %v750_v31 }
 0x25d   :  { %824 = vmatpush.msrb.mxu0 %v788_v35 }
 0x25e   :  { %913 = vmatpush.msrb.mxu3 %v752_v36 }
 0x25f   :  { %827 = vmatpush.msrb.mxu0 %v794_v40 }
 0x260   :  { %649 = vmatmul.f32.vlgmr.msra.gmra.mxu0 %v513_v48 }
 0x2cd   :  { %v560_v53 = vpop.f32.mrf.mxu1 }
 0x2d5   :  { %v519_v54 = vpop.f32.mrf.mxu0  ;;  %v590_v56 = vpop.f32.mrf.mxu2 }
 0x2d6   :  { %v561_v55 = vadd.f32 %v560_v53, %v519_v54  ;;  %v675_v62 = vpop.f32.mrf.mxu1 }
 0x2d7   :  { %v617_v58 = vpop.f32.mrf.mxu3 }
 0x2d8   :  { %v591_v57 = vadd.f32 %v590_v56, %v561_v55 }
 0x2da   :  { %v618_v59 = vadd.f32 %v617_v58, %v591_v57 }
 0x2dd   :  { %v650_v60 = vpop.f32.mrf.mxu0 }
 0x2de   :  { %v651_v61 = vadd.f32 %v650_v60, %v618_v59 }
 0x2e0   :  { %v1291_v63 = vadd.f32 %v675_v62, %v651_v61  ;;  %v976_v62 = vld [vmem:[%s1333_s7] ss:$0 sm:$0xff]  ;;  %s1196_s7 = smov 112  }
 0x2e2   :  { %v680_v0 = vmul.f32 %v1291_v63, %v1291_v63 }
 0x2e4   :  { %682 = vrot.lane.b32.xlu1 %v680_v0, %s1193_s4 }
 0x356   :  { %v683_v1 = vpop.permute.xlu1 %682 }
 0x357   :  { %v685_v2 = vsel %vm446_vm2, %v1291_v63, %v683_v1 }
 0x358   :  { %v686_v3 = vsel %vm448_vm3, %v685_v2, 0.0 }
 0x359   :  { %v687_v4 = vrot.slane %v686_v3, 4 }
 0x35b   :  { %v688_v5 = vadd.f32 %v687_v4, %v686_v3 }
 0x35d   :  { %v689_v6 = vrot.slane %v688_v5, 2 }
 0x35f   :  { %v690_v7 = vadd.f32 %v689_v6, %v688_v5 }
 0x361   :  { %v691_v8 = vrot.slane %v690_v7, 1 }
 0x363   :  { %v692_v9 = vadd.f32 %v691_v8, %v690_v7 }
 0x365   :  { %v1299_v10 = vmul.f32 0.125, %v692_v9 }
 0x367   :  { %v694_v11 = vmul.f32 %v1299_v10, %v1299_v10  ;;  %v717_v50 = vsub.f32 %v1291_v63, %v1299_v10 }
 0x369   :  { %696 = vrot.lane.b32.xlu2 %v694_v11, %s1193_s4 }
 0x3c3   :  { %v697_v12 = vpop.permute.xlu2 %696 }
 0x3c4   :  { %v699_v13 = vsub.f32 %v1299_v10, %v697_v12 }
 0x3c6   :  { %v700_v14 = vmax.f32 %v699_v13, 0.0 }
 0x3c8   :  { %v701_v15 = vadd.f32 1e-05, %v700_v14 }
 0x3ca   :  { %979 = vrsqrt.f32 %v701_v15  ;;  %vm708_vm8 = vweird.f32 %v701_v15 }
 0x3d0   :  { %v980_v16 = vpop.eup %979 }
 0x3d1   :  { %v703_v17 = vmul.f32 %v980_v16, %v701_v15  ;;  %vm709_vm7 = vweird.f32 %v980_v16 }
 0x3d2   :  { %vm710_vm9 = vmor %vm708_vm8, %vm709_vm7 }
 0x3d3   :  { %v704_v18 = vmul.f32 %v980_v16, %v703_v17 }
 0x3d5   :  { %v705_v19 = vmul.f32 0.5, %v704_v18 }
 0x3d7   :  { %v706_v20 = vsub.f32 1.5, %v705_v19 }
 0x3d9   :  { %v707_v21 = vmul.f32 %v980_v16, %v706_v20 }
 0x3db   :  { %v711_v22 = vsel %vm710_vm9, %v980_v16, %v707_v21 }
 0x3dc   :  { %713 = vrot.lane.b32.xlu2 %v711_v22, %s1194_s6 }
 0x436   :  { %v714_v48 = vpop.permute.xlu2 %713 }
 0x437   :  { %v716_v49 = vmul.f32 %v714_v48, %v678_v47 }
 0x439   :  { %v718_v52 = vperm.slane %v716_v49, 0 }
 0x43b   :  { %v719_v53 = vmul.f32 %v718_v52, %v717_v50 }
 0x43d   :  { %v721_v54 = vadd.f32 %v975_v51, %v719_v53 }
 0x43f   :  { %v722_v55 = vmax.f32 %v721_v54, 0.0 }
 0x441   :  { %v732_v56 = vsel %vm446_vm2, %v722_v55, 0 }
 0x442   :  { %v754_v57 = vand.u32 4294901760, %v732_v56 }
 0x444   :  { %800 = vmatmul.f32.vlgmr.msra.gmra.mxu3 %v754_v57  ;;  %v755_v58 = vsub.f32 %v732_v56, %v754_v57 }
 0x446   :  { %830 = vmatmul.f32.vlgmr.msrb.gmra.mxu0 %v755_v58  ;;  %v756_v59 = vand.u32 4294901760, %v755_v58 }
 0x448   :  { %857 = vmatmul.f32.vlgmr.msrb.gmra.mxu1 %v756_v59  ;;  %v757_v60 = vsub.f32 %v755_v58, %v756_v59 }
 0x44a   :  { %v758_v61 = vand.u32 4294901760, %v757_v60 }
 0x44c   :  { %759 = vmatmul.f32.vlgmr.msra.gmra.mxu2 %v758_v61  ;;  %915 = vmatmul.f32.vlgmr.msrb.gmra.mxu3 %v754_v57 }
 0x454   :  { %890 = vmatmul.f32.vlgmr.msrb.gmra.mxu2 %v754_v57 }
 0x4c3   :  { %v831_v3 = vpop.f32.mrf.mxu0 }
 0x4c5   :  { %v858_v5 = vpop.f32.mrf.mxu1 }
 0x4c7   :  { %v801_v63 = vpop.f32.mrf.mxu3 }
 0x4cf   :  { %v760_v0 = vpop.f32.mrf.mxu2  ;;  %v916_v9 = vpop.f32.mrf.mxu3 }
 0x4d0   :  { %v761_v1 = vadd.f32 %v976_v62, %v760_v0 }
 0x4d2   :  { %v802_v2 = vadd.f32 %v801_v63, %v761_v1 }
 0x4d4   :  { %v832_v4 = vadd.f32 %v831_v3, %v802_v2 }
 0x4d6   :  { %v859_v6 = vadd.f32 %v858_v5, %v832_v4 }
 0x4d7   :  { %v891_v7 = vpop.f32.mrf.mxu2 }
 0x4d8   :  { %v892_v8 = vadd.f32 %v891_v7, %v859_v6 }
 0x4da   :  { %v917_v10 = vadd.f32 %v916_v9, %v892_v8 }
 0x4dc   :  { %919 = vst.msk [vmem:[#allocation13] sm:$0xff] %vm276_vm1, %v917_v10  ;;  %921 = vrot.lane.b32.xlu0 %v917_v10, %s1196_s7 }
 0x4dd   :  { %935 = dma.vmem_to_hbm [thread:$0]  %s931_s25, 128, %s933_s27, [#allocation4]  }
 0x54e   :  { %v922_v11 = vpop.permute.xlu0 %921 }
 0x54f   :  { %924 = vst.msk [vmem:[#allocation14] sm:$0xff] %vm276_vm1, %v922_v11 }
 0x550   :  { %946 = dma.vmem_to_hbm [thread:$0]  %s942_s29, 128, %s944_s10, [#allocation15]  }
 0x551   :  { %1181 = dma.done.wait [#allocation4], 128  }
 0x552   :  { %1182 = vsyncadd [#allocation4], 4294967168 }
 0x553   :  { %1183 = dma.done.wait [#allocation15], 128  }
 0x554   :  { %1184 = vsyncadd [#allocation15], 4294967168 }
 0x555   :  { %955 = vsyncpa [#allocation3], 1 }
 0x556   :  { %956 = vsyncpa [#allocation6], 1 }
 0x557   :  { %957 = vsyncpa [#allocation9], 1 }
 0x558   :  { %958 = vsyncpa [#allocation12], 1 }
 0x559   :  { %959 = vsyncpa [#allocation4], 1 }
 0x55a   :  { %960 = vsyncpa [#allocation15], 1 }

</bundles_post_ra>
